<compile_context>
chip_gen: v5e
topology: v5e:2x2
jax: 0.10.0
libtpu: 0.0.40
codegen_flags: <defaults>
</compile_context>

<pallas_src>
import math

import jax
import jax.numpy as jnp
from jax.experimental import pallas as pl
from jax.experimental.pallas import tpu as pltpu

LANES = 128
SUBLANES = 8                         # f32 sublane granularity
MAX_TILE_ROWS = 4096                 # (4096,128) f32 block = 2 MiB
VMEM_LIMIT_BYTES = 32 * 1024 * 1024  # safe on v5e/v6e (128 MiB) and v7x (64 MiB)


def _num_tensorcores():
    """Best-effort TensorCores-per-chip: 2 on v7x-class parts, else 1."""
    try:
        kind = jax.devices()[0].device_kind.lower()
    except Exception:
        return 1
    return 2 if ("v7" in kind or "7x" in kind) else 1


def _make_kernel(tile_rows, steps, rows, needs_row_mask):
    chunks = tile_rows // SUBLANES

    def accumulate(acc_ref, x, t):
        # Reshape (tile_rows,128) -> (chunks,8,128): sublane-split only, layout
        # trivial; the axis-0 reduce lands on whole (8,128) vregs.
        x = x.reshape(chunks, SUBLANES, LANES)
        t = t.reshape(chunks, SUBLANES, LANES)
        # One shared transcendental: z = exp(-|x|) feeds both BCE and sigmoid.
        z = jnp.exp(-jnp.abs(x))
        sig = jnp.where(x >= 0.0, 1.0, z) / (1.0 + z)       # == sigmoid(x)
        bce = jnp.maximum(x, 0.0) - x * t + jnp.log1p(z)    # stable BCE-with-logits
        acc_ref[0, :, :] += jnp.sum(bce, axis=0)
        acc_ref[1, :, :] += jnp.sum(sig * t, axis=0)
        acc_ref[2, :, :] += jnp.sum(sig, axis=0)
        acc_ref[3, :, :] += jnp.sum(t, axis=0)

    def kernel(x_ref, t_ref, out_ref, acc_ref):
        s = pl.program_id(0)       # shard (parallel)
        i = pl.program_id(1)       # reduction step within shard (arbitrary)

        @pl.when(i == 0)
        def _():
            acc_ref[...] = jnp.zeros_like(acc_ref)

        x = x_ref[...].astype(jnp.float32)
        t = t_ref[...].astype(jnp.float32)

        if needs_row_mask:
            linear = s * steps + i
            # Only the block that extends past `rows` (the ragged last block,
            # or a clamped duplicate block) pays for the mask work.
            is_partial = (linear + 1) * tile_rows > rows

            @pl.when(is_partial)
            def _():
                row = jax.lax.broadcasted_iota(jnp.int32, (tile_rows, LANES), 0)
                valid = linear * tile_rows + row < rows
                accumulate(acc_ref,
                           jnp.where(valid, x, 0.0),
                           jnp.where(valid, t, 0.0))

            @pl.when(jnp.logical_not(is_partial))
            def _():
                accumulate(acc_ref, x, t)
        else:
            accumulate(acc_ref, x, t)

        @pl.when(i == steps - 1)
        def _():
            out_ref[...] = acc_ref[...].reshape(out_ref.shape)

    return kernel


def balanced_loss(input_logits, target, smooth=1.0, bce_weight=0.3, dice_weight=0.7):
    """Pallas implementation of BalancedLoss.forward (returns a scalar f32)."""
    x = input_logits.reshape(-1)                       # keep native dtype
    t = target.reshape(-1)
    if not jnp.issubdtype(t.dtype, jnp.floating):
        t = t.astype(jnp.float32)
    n = x.shape[0]

    # Pad only to a 128-lane multiple (no full-copy (8*128) pad for typical NCHW
    # shapes).  Tiny inputs (<1024 elements) are padded to one (8,128) tile so
    # a single full block covers them.  Pad elements are zeros; masked /
    # duplicated slots also behave as zeros; both are corrected analytically.
    if n < SUBLANES * LANES:
        pad = SUBLANES * LANES - n
    else:
        pad = (-n) % LANES
    if pad:
        x = jnp.pad(x, (0, pad))
        t = jnp.pad(t, (0, pad))
    rows = (n + pad) // LANES

    x2 = x.reshape(rows, LANES)
    t2 = t.reshape(rows, LANES)

    rows8 = -(-rows // SUBLANES) * SUBLANES            # round rows up to 8
    tile_rows = min(MAX_TILE_ROWS, rows8)              # multiple of 8
    row_blocks = -(-rows // tile_rows)                 # cdiv
    num_cores = _num_tensorcores()
    num_shards = num_cores if row_blocks >= num_cores else 1
    steps = -(-row_blocks // num_shards)               # cdiv
    covered_rows = num_shards * steps * tile_rows
    needs_row_mask = covered_rows > rows
    # Slots behaving as (x=0, t=0): explicit lane pad + masked out-of-range /
    # duplicated rows.  Each contributes bce=log2, sigmoid=0.5, t=0.
    zero_count = covered_rows * LANES - n              # static Python int

    def in_idx(s, i):
        # Clamp so every block start stays in bounds; clamped (duplicate) steps
        # are fully masked in-kernel, so they contribute exactly zero.
        return (jnp.minimum(s * steps + i, row_blocks - 1), 0)

    kernel = _make_kernel(tile_rows, steps, rows, needs_row_mask)

    partial = pl.pallas_call(
        kernel,
        out_shape=jax.ShapeDtypeStruct((num_shards, 4, SUBLANES, LANES), jnp.float32),
        grid=(num_shards, steps),
        in_specs=[
            pl.BlockSpec((tile_rows, LANES), in_idx),
            pl.BlockSpec((tile_rows, LANES), in_idx),
        ],
        out_specs=pl.BlockSpec((1, 4, SUBLANES, LANES), lambda s, i: (s, 0, 0, 0)),
        scratch_shapes=[pltpu.VMEM((4, SUBLANES, LANES), jnp.float32)],
        compiler_params=pltpu.CompilerParams(
            dimension_semantics=("parallel", "arbitrary"),
            vmem_limit_bytes=VMEM_LIMIT_BYTES),
    )(x2, t2)

    sums = jnp.sum(partial, axis=(0, 2, 3))            # (4,) tiny cross-lane reduce
    bce_sum = sums[0] - jnp.float32(zero_count * math.log(2.0))
    intersection = sums[1]
    sig_sum = sums[2] - jnp.float32(zero_count * 0.5)
    t_sum = sums[3]

    bce_loss = bce_sum / jnp.float32(n)                # 'mean' reduction, as in PyTorch
    dice_score = (2.0 * intersection + smooth) / (sig_sum + t_sum + smooth)
    dice_loss = 1.0 - dice_score
    return bce_weight * bce_loss + dice_weight * dice_loss


def _reference(input_logits, target, smooth=1.0, bce_weight=0.3, dice_weight=0.7):
    x = input_logits.reshape(-1).astype(jnp.float32)
    t = target.reshape(-1).astype(jnp.float32)
    bce = jnp.mean(jnp.maximum(x, 0.0) - x * t + jnp.log1p(jnp.exp(-jnp.abs(x))))
    sig = jax.nn.sigmoid(x)
    inter = jnp.sum(sig * t)
    dice_score = (2.0 * inter + smooth) / (jnp.sum(sig) + jnp.sum(t) + smooth)
    return bce_weight * bce + dice_weight * (1.0 - dice_score)


if __name__ == "__main__":
    key = jax.random.PRNGKey(0)
    k1, k2, k3, k4, k5, k6 = jax.random.split(key, 6)

    # Small NCHW shapes consistent with a segmentation head (single full block).
    x_small = jax.random.normal(k1, (2, 4, 16, 16), dtype=jnp.float32)            # logits
    t_small = (jax.random.uniform(k2, (2, 4, 16, 16)) > 0.5).astype(jnp.float32)  # binary GT
    loss = jax.block_until_ready(balanced_loss(x_small, t_small))
    ref = jax.block_until_ready(_reference(x_small, t_small))
    assert jnp.allclose(loss, ref, atol=1e-5, rtol=1e-5), (loss, ref)

    # bfloat16 logits: native-dtype streaming, upcast happens inside the kernel.
    x_bf16 = x_small.astype(jnp.bfloat16)
    loss_bf = jax.block_until_ready(balanced_loss(x_bf16, t_small))
    ref_bf = jax.block_until_ready(_reference(x_bf16, t_small))
    assert jnp.allclose(loss_bf, ref_bf, atol=1e-5, rtol=1e-5), (loss_bf, ref_bf)

    # Larger case: multi-block grid, ragged (non-multiple-of-8) row count, the
    # pl.when-gated mask on the last block, and the shard split on 2-TC chips.
    x_big = jax.random.normal(k3, (2, 4, 300, 300), dtype=jnp.float32)
    t_big = (jax.random.uniform(k4, (2, 4, 300, 300)) > 0.5).astype(jnp.float32)
    loss_b = jax.block_until_ready(balanced_loss(x_big, t_big))
    ref_b = jax.block_until_ready(_reference(x_big, t_big))
    assert jnp.allclose(loss_b, ref_b, atol=1e-4, rtol=1e-4), (loss_b, ref_b)

    # Odd element count (not a lane multiple): tiny-input pad path + the
    # analytic zero-slot correction.
    x_odd = jax.random.normal(k5, (1, 1, 17, 19), dtype=jnp.float32)
    t_odd = (jax.random.uniform(k6, (1, 1, 17, 19)) > 0.5).astype(jnp.float32)
    loss_o = jax.block_until_ready(balanced_loss(x_odd, t_odd))
    ref_o = jax.block_until_ready(_reference(x_odd, t_odd))
    assert jnp.allclose(loss_o, ref_o, atol=1e-5, rtol=1e-5), (loss_o, ref_o)

    print("KERNEL_OK")
</pallas_src>

<mosaic_0001>
module attributes {stable_mosaic.version = 11 : i64} {
  func.func @kernel(%arg0: i32, %arg1: i32, %arg2: memref<16x128xf32, #tpu.memory_space<vmem>>, %arg3: memref<16x128xf32, #tpu.memory_space<vmem>>, %arg4: memref<1x4x8x128xf32, #tpu.memory_space<vmem>>, %arg5: memref<4x8x128xf32, #tpu.memory_space<vmem>>) attributes {dimension_semantics = [#tpu.dimension_semantics<parallel>, #tpu.dimension_semantics<arbitrary>], iteration_bounds = array<i64: 1, 1>, scalar_prefetch = 0 : i64, scratch_operands = 1 : i64, tpu.core_type = #tpu.core_type<tc>, window_params = [{transform_indices = @transform_0, window_bounds = array<i64: 16, 128>}, {transform_indices = @transform_1, window_bounds = array<i64: 16, 128>}, {transform_indices = @transform_2, window_bounds = array<i64: 1, 4, 8, 128>}]} {
    %c0_i32 = arith.constant 0 : i32
    %0 = arith.cmpi eq, %arg1, %c0_i32 : i32
    %1 = arith.extui %0 : i1 to i32
    %c0_i32_0 = arith.constant 0 : i32
    %2 = arith.cmpi ne, %1, %c0_i32_0 : i32
    scf.if %2 {
      %cst_35 = arith.constant 0.000000e+00 : f32
      %56 = vector.broadcast %cst_35 : f32 to vector<4x8x128xf32>
      %c0_36 = arith.constant 0 : index
      %c0_37 = arith.constant 0 : index
      %c0_38 = arith.constant 0 : index
      %57 = vector.load %arg5[%c0_36, %c0_37, %c0_38] : memref<4x8x128xf32, #tpu.memory_space<vmem>>, vector<4x8x128xf32>
      tpu.vector_store %arg5[%c0_36, %c0_37, %c0_38], %56 {strides = array<i32>} : memref<4x8x128xf32, #tpu.memory_space<vmem>>, vector<4x8x128xf32>,
    } else {
    }
    %c0 = arith.constant 0 : index
    %c0_1 = arith.constant 0 : index
    %3 = vector.load %arg2[%c0, %c0_1] : memref<16x128xf32, #tpu.memory_space<vmem>>, vector<16x128xf32>
    %c0_2 = arith.constant 0 : index
    %c0_3 = arith.constant 0 : index
    %4 = vector.load %arg3[%c0_2, %c0_3] : memref<16x128xf32, #tpu.memory_space<vmem>>, vector<16x128xf32>
    %5 = vector.shape_cast %3 : vector<16x128xf32> to vector<2x8x128xf32>
    %6 = vector.shape_cast %4 : vector<16x128xf32> to vector<2x8x128xf32>
    %7 = math.absf %5 : vector<2x8x128xf32>
    %cst = arith.constant 0.000000e+00 : f32
    %8 = vector.broadcast %cst : f32 to vector<2x8x128xf32>
    %9 = arith.subf %8, %7 : vector<2x8x128xf32>
    %10 = math.exp %9 : vector<2x8x128xf32>
    %cst_4 = arith.constant 0.000000e+00 : f32
    %11 = vector.broadcast %cst_4 : f32 to vector<2x8x128xf32>
    %12 = arith.cmpf oge, %5, %11 : vector<2x8x128xf32>
    %cst_5 = arith.constant 1.000000e+00 : f32
    %13 = vector.broadcast %cst_5 : f32 to vector<2x8x128xf32>
    %14 = arith.select %12, %13, %10 : vector<2x8x128xi1>, vector<2x8x128xf32>
    %cst_6 = arith.constant 1.000000e+00 : f32
    %15 = vector.broadcast %cst_6 : f32 to vector<2x8x128xf32>
    %16 = arith.addf %15, %10 : vector<2x8x128xf32>
    %17 = arith.divf %14, %16 : vector<2x8x128xf32>
    %cst_7 = arith.constant 0.000000e+00 : f32
    %18 = vector.broadcast %cst_7 : f32 to vector<2x8x128xf32>
    %19 = arith.maximumf %5, %18 : vector<2x8x128xf32>
    %20 = arith.mulf %5, %6 : vector<2x8x128xf32>
    %21 = arith.subf %19, %20 : vector<2x8x128xf32>
    %22 = math.log1p %10 : vector<2x8x128xf32>
    %23 = arith.addf %21, %22 : vector<2x8x128xf32>
    %c0_8 = arith.constant 0 : index
    %c0_9 = arith.constant 0 : index
    %c0_10 = arith.constant 0 : index
    %24 = vector.load %arg5[%c0_8, %c0_9, %c0_10] : memref<4x8x128xf32, #tpu.memory_space<vmem>>, vector<1x8x128xf32>
    %25 = vector.shape_cast %24 : vector<1x8x128xf32> to vector<8x128xf32>
    %cst_11 = arith.constant dense<0.000000e+00> : vector<8x128xf32>
    %26 = vector.multi_reduction <add>, %23, %cst_11 [0] : vector<2x8x128xf32> to vector<8x128xf32>
    %27 = arith.addf %25, %26 : vector<8x128xf32>
    %c0_12 = arith.constant 0 : index
    %c0_13 = arith.constant 0 : index
    %c0_14 = arith.constant 0 : index
    %28 = vector.load %arg5[%c0_12, %c0_13, %c0_14] : memref<4x8x128xf32, #tpu.memory_space<vmem>>, vector<1x8x128xf32>
    %29 = vector.shape_cast %28 : vector<1x8x128xf32> to vector<8x128xf32>
    %30 = vector.shape_cast %27 : vector<8x128xf32> to vector<1x8x128xf32>
    tpu.vector_store %arg5[%c0_12, %c0_13, %c0_14], %30 {strides = array<i32>} : memref<4x8x128xf32, #tpu.memory_space<vmem>>, vector<1x8x128xf32>,
    %c1 = arith.constant 1 : index
    %c0_15 = arith.constant 0 : index
    %c0_16 = arith.constant 0 : index
    %31 = vector.load %arg5[%c1, %c0_15, %c0_16] : memref<4x8x128xf32, #tpu.memory_space<vmem>>, vector<1x8x128xf32>
    %32 = vector.shape_cast %31 : vector<1x8x128xf32> to vector<8x128xf32>
    %33 = arith.mulf %17, %6 : vector<2x8x128xf32>
    %cst_17 = arith.constant dense<0.000000e+00> : vector<8x128xf32>
    %34 = vector.multi_reduction <add>, %33, %cst_17 [0] : vector<2x8x128xf32> to vector<8x128xf32>
    %35 = arith.addf %32, %34 : vector<8x128xf32>
    %c1_18 = arith.constant 1 : index
    %c0_19 = arith.constant 0 : index
    %c0_20 = arith.constant 0 : index
    %36 = vector.load %arg5[%c1_18, %c0_19, %c0_20] : memref<4x8x128xf32, #tpu.memory_space<vmem>>, vector<1x8x128xf32>
    %37 = vector.shape_cast %36 : vector<1x8x128xf32> to vector<8x128xf32>
    %38 = vector.shape_cast %35 : vector<8x128xf32> to vector<1x8x128xf32>
    tpu.vector_store %arg5[%c1_18, %c0_19, %c0_20], %38 {strides = array<i32>} : memref<4x8x128xf32, #tpu.memory_space<vmem>>, vector<1x8x128xf32>,
    %c2 = arith.constant 2 : index
    %c0_21 = arith.constant 0 : index
    %c0_22 = arith.constant 0 : index
    %39 = vector.load %arg5[%c2, %c0_21, %c0_22] : memref<4x8x128xf32, #tpu.memory_space<vmem>>, vector<1x8x128xf32>
    %40 = vector.shape_cast %39 : vector<1x8x128xf32> to vector<8x128xf32>
    %cst_23 = arith.constant dense<0.000000e+00> : vector<8x128xf32>
    %41 = vector.multi_reduction <add>, %17, %cst_23 [0] : vector<2x8x128xf32> to vector<8x128xf32>
    %42 = arith.addf %40, %41 : vector<8x128xf32>
    %c2_24 = arith.constant 2 : index
    %c0_25 = arith.constant 0 : index
    %c0_26 = arith.constant 0 : index
    %43 = vector.load %arg5[%c2_24, %c0_25, %c0_26] : memref<4x8x128xf32, #tpu.memory_space<vmem>>, vector<1x8x128xf32>
    %44 = vector.shape_cast %43 : vector<1x8x128xf32> to vector<8x128xf32>
    %45 = vector.shape_cast %42 : vector<8x128xf32> to vector<1x8x128xf32>
    tpu.vector_store %arg5[%c2_24, %c0_25, %c0_26], %45 {strides = array<i32>} : memref<4x8x128xf32, #tpu.memory_space<vmem>>, vector<1x8x128xf32>,
    %c3 = arith.constant 3 : index
    %c0_27 = arith.constant 0 : index
    %c0_28 = arith.constant 0 : index
    %46 = vector.load %arg5[%c3, %c0_27, %c0_28] : memref<4x8x128xf32, #tpu.memory_space<vmem>>, vector<1x8x128xf32>
    %47 = vector.shape_cast %46 : vector<1x8x128xf32> to vector<8x128xf32>
    %cst_29 = arith.constant dense<0.000000e+00> : vector<8x128xf32>
    %48 = vector.multi_reduction <add>, %6, %cst_29 [0] : vector<2x8x128xf32> to vector<8x128xf32>
    %49 = arith.addf %47, %48 : vector<8x128xf32>
    %c3_30 = arith.constant 3 : index
    %c0_31 = arith.constant 0 : index
    %c0_32 = arith.constant 0 : index
    %50 = vector.load %arg5[%c3_30, %c0_31, %c0_32] : memref<4x8x128xf32, #tpu.memory_space<vmem>>, vector<1x8x128xf32>
    %51 = vector.shape_cast %50 : vector<1x8x128xf32> to vector<8x128xf32>
    %52 = vector.shape_cast %49 : vector<8x128xf32> to vector<1x8x128xf32>
    tpu.vector_store %arg5[%c3_30, %c0_31, %c0_32], %52 {strides = array<i32>} : memref<4x8x128xf32, #tpu.memory_space<vmem>>, vector<1x8x128xf32>,
    %c0_i32_33 = arith.constant 0 : i32
    %53 = arith.cmpi eq, %arg1, %c0_i32_33 : i32
    %54 = arith.extui %53 : i1 to i32
    %c0_i32_34 = arith.constant 0 : i32
    %55 = arith.cmpi ne, %54, %c0_i32_34 : i32
    scf.if %55 {
      %c0_35 = arith.constant 0 : index
      %c0_36 = arith.constant 0 : index
      %c0_37 = arith.constant 0 : index
      %56 = vector.load %arg5[%c0_35, %c0_36, %c0_37] : memref<4x8x128xf32, #tpu.memory_space<vmem>>, vector<4x8x128xf32>
      %57 = vector.shape_cast %56 : vector<4x8x128xf32> to vector<1x4x8x128xf32>
      %c0_38 = arith.constant 0 : index
      %c0_39 = arith.constant 0 : index
      %c0_40 = arith.constant 0 : index
      %c0_41 = arith.constant 0 : index
      %58 = vector.load %arg4[%c0_38, %c0_39, %c0_40, %c0_41] : memref<1x4x8x128xf32, #tpu.memory_space<vmem>>, vector<1x4x8x128xf32>
      tpu.vector_store %arg4[%c0_38, %c0_39, %c0_40, %c0_41], %57 {strides = array<i32>} : memref<1x4x8x128xf32, #tpu.memory_space<vmem>>, vector<1x4x8x128xf32>,
    } else {
    }
    return
  }
  func.func @transform_0(%arg0: i32, %arg1: i32) -> (i32, i32) {
    %c1_i32 = arith.constant 1 : i32
    %0 = arith.muli %arg0, %c1_i32 : i32
    %1 = arith.addi %0, %arg1 : i32
    %c0_i32 = arith.constant 0 : i32
    %2 = arith.minsi %1, %c0_i32 : i32
    %c0_i32_0 = arith.constant 0 : i32
    %c0_i32_1 = arith.constant 0 : i32
    return %2, %c0_i32_0 : i32, i32
  }
  func.func @transform_1(%arg0: i32, %arg1: i32) -> (i32, i32) {
    %c1_i32 = arith.constant 1 : i32
    %0 = arith.muli %arg0, %c1_i32 : i32
    %1 = arith.addi %0, %arg1 : i32
    %c0_i32 = arith.constant 0 : i32
    %2 = arith.minsi %1, %c0_i32 : i32
    %c0_i32_0 = arith.constant 0 : i32
    %c0_i32_1 = arith.constant 0 : i32
    return %2, %c0_i32_0 : i32, i32
  }
  func.func @transform_2(%arg0: i32, %arg1: i32) -> (i32, i32, i32, i32) {
    %c0_i32 = arith.constant 0 : i32
    %c0_i32_0 = arith.constant 0 : i32
    %c0_i32_1 = arith.constant 0 : i32
    %c0_i32_2 = arith.constant 0 : i32
    return %arg0, %c0_i32, %c0_i32_0, %c0_i32_1 : i32, i32, i32, i32
  }
}

</mosaic_0001>

<bundles_post_ra>
// kernel: tpu_custom_call.1
= control target key start
LH: loop header
LB: loop body
LE: loop exit
PB: predicated region body
PF: predicated region fallthrough
CT: control target
= control target key end

     0   :  { %7 = vsyncpa [#allocation4], 0  ;;  %s373_s0 = inlined_call_operand.hbm [shape: f32[16,128], index: 0, kind: input, shape index: {}]   ;;  %s374_s1 = inlined_call_operand.hbm [shape: f32[16,128], index: 1, kind: input, shape index: {}]   ;;  %s375_s2 = inlined_call_operand.hbm [shape: f32[1,4,8,128], index: 2, kind: output, shape index: {}]  }
   0x1   :  { %8 = vsyncpa [#allocation7], 0 }
   0x2   :  { %9 = vsyncpa [#allocation5], 0  ;;  %s20_s11 = sshll.u32 %s373_s0, 4  ;;  %s297_s12 = smov [#allocation3]   ;;  %s21_s11 = int_to_ptr.hbm [resolvable:$true] %s20_s11 }
   0x3   :  { %s22_s13 = sshll.u32 %s297_s12, 4  ;;  %s39_s16 = sshll.u32 %s374_s1, 4  ;;  %s23_s13 = int_to_ptr.vmem [resolvable:$true] %s22_s13  ;;  %s40_s16 = int_to_ptr.hbm [resolvable:$true] %s39_s16 }
   0x4   :  { %s298_s17 = smov 128   ;;  %s299_s18 = smov 8  }
   0x5   :  { %28 = dma.hbm_to_vmem [thread:$0]  %s21_s11, 256, %s23_s13, [#allocation4], %s298_s17, %s298_s17, %s299_s18  }
   0x6   :  { %s300_s19 = smov [#allocation6]  }
   0x7   :  { %s41_s20 = sshll.u32 %s300_s19, 4  ;;  %s42_s20 = int_to_ptr.vmem [resolvable:$true] %s41_s20 }
   0x8   :  { %47 = dma.hbm_to_vmem [thread:$0]  %s40_s16, 256, %s42_s20, [#allocation7], %s298_s17, %s298_s17, %s299_s18  }
   0x9   :  { %291 = dma.done.wait [#allocation4], 256  }
   0xa   :  { %292 = vsyncadd [#allocation4], 4294967040 }
   0xb   :  { %293 = dma.done.wait [#allocation7], 256  }
   0xc   :  { %294 = vsyncadd [#allocation7], 4294967040  ;;  %v329_v0 = vld [vmem:[#allocation3] sm:$0xff]  ;;  %v331_v1 = vld [vmem:[#allocation3 + $0x8] sm:$0xff]  ;;  %s301_s0 = smov [#allocation8]   ;;  %s184_s23 = sshll.u32 %s375_s2, 4  ;;  %s185_s23 = int_to_ptr.hbm [resolvable:$true] %s184_s23 }
   0xd   :  { %v76_v2 = vand.u32 2147483647, %v329_v0  ;;  %v77_v3 = vand.u32 2147483647, %v331_v1  ;;  %v335_v6 = vld [vmem:[#allocation6] sm:$0xff]  ;;  %v337_v7 = vld [vmem:[#allocation6 + $0x8] sm:$0xff] }
   0xe   :  { %v164_v10 = vadd.f32 %v337_v7, %v335_v6  ;;  %v120_v17 = vmax.f32 %v329_v0, 0.0  ;;  %v122_v18 = vmul.f32 %v335_v6, %v329_v0  ;;  %v121_v19 = vmax.f32 %v331_v1, 0.0  ;;  %s182_s1 = sshll.u32 %s301_s0, 4  ;;  %s183_s1 = int_to_ptr.vmem [resolvable:$true] %s182_s1 }
   0xf   :  { %v78_v4 = vsub.f32 0.0, %v76_v2  ;;  %v79_v5 = vsub.f32 0.0, %v77_v3  ;;  %v123_v20 = vmul.f32 %v337_v7, %v331_v1  ;;  %vm84_vm6 = vcmp.ge.f32.partialorder %v329_v0, 0.0 }
  0x10   :  { %177 = vst [vmem:[#allocation8 + $0x18] sm:$0xff] %v164_v10  ;;  %v124_v26 = vsub.f32 %v120_v17, %v122_v18  ;;  %vm85_vm7 = vcmp.ge.f32.partialorder %v331_v1, 0.0 }
  0x11   :  { %v80_v8 = vmul.f32 1.442695, %v78_v4  ;;  %v82_v9 = vmul.f32 1.442695, %v79_v5  ;;  %v125_v27 = vsub.f32 %v121_v19, %v123_v20 }
  0x13   :  { %207 = vpow2.f32 %v80_v8 }
  0x14   :  { %209 = vpow2.f32 %v82_v9 }
  0x19   :  { %v208_v11 = vpop.eup %207 }
  0x1a   :  { %v210_v12 = vpop.eup %209  ;;  %v88_v13 = vadd.f32 1.0, %v208_v11  ;;  %v129_v15 = vmul.f32 -0.5, %v208_v11  ;;  %v132_v21 = vand.u32 2147483647, %v208_v11  ;;  %v86_v54 = vsel %vm84_vm6, 1.0, %v208_v11 }
  0x1b   :  { %v89_v14 = vadd.f32 1.0, %v210_v12  ;;  %v138_v16 = vmul.f32 -0.5, %v210_v12  ;;  %v141_v23 = vand.u32 2147483647, %v210_v12  ;;  %v87_v57 = vsel %vm85_vm7, 1.0, %v210_v12 }
  0x1c   :  { %211 = vrcp.f32 %v88_v13  ;;  %v130_v22 = vadd.f32 1.0, %v129_v15  ;;  %vm347_vm0 = vcmp.lt.f32.partialorder %v132_v21, 0.0004427343  ;;  %vm95_vm1 = vweird.f32 %v88_v13 }
  0x1d   :  { %213 = vrcp.f32 %v89_v14  ;;  %v139_v24 = vadd.f32 1.0, %v138_v16  ;;  %vm351_vm2 = vcmp.lt.f32.partialorder %v141_v23, 0.0004427343  ;;  %v99_v33 = vand.u32 2147483647, %v88_v13 }
  0x1e   :  { %215 = vlog2.f32 %v88_v13  ;;  %v131_v30 = vmul.f32 %v208_v11, %v130_v22  ;;  %v101_v36 = vand.u32 2147483648, %v88_v13  ;;  %vm110_vm3 = vweird.f32 %v89_v14 }
  0x1f   :  { %217 = vlog2.f32 %v89_v14  ;;  %v140_v35 = vmul.f32 %v210_v12, %v139_v24  ;;  %v116_v41 = vand.u32 2147483648, %v89_v14  ;;  %v114_v44 = vand.u32 2147483647, %v89_v14 }
  0x20   :  { %v102_v49 = vor.u32 1.1754944e-38, %v101_v36  ;;  %vm100_vm9 = vcmp.eq.f32.partialorder %v99_v33, 8.507059e+37 }
  0x21   :  { %v117_v53 = vor.u32 1.1754944e-38, %v116_v41  ;;  %vm115_vm11 = vcmp.eq.f32.partialorder %v114_v44, 8.507059e+37 }
  0x22   :  { %v212_v25 = vpop.eup %211 }
  0x23   :  { %v214_v29 = vpop.eup %213  ;;  %v91_v32 = vmul.f32 %v212_v25, %v88_v13  ;;  %vm96_vm4 = vweird.f32 %v212_v25 }
  0x24   :  { %v216_v34 = vpop.eup %215  ;;  %v106_v37 = vmul.f32 %v214_v29, %v89_v14  ;;  %vm111_vm5 = vweird.f32 %v214_v29  ;;  %vm97_vm8 = vmor %vm95_vm1, %vm96_vm4 }
  0x25   :  { %v218_v38 = vpop.eup %217  ;;  %v128_v39 = vmul.f32 0.6931472, %v216_v34  ;;  %v92_v40 = vsub.f32 1.0, %v91_v32  ;;  %vm112_vm10 = vmor %vm110_vm3, %vm111_vm5 }
  0x26   :  { %v137_v42 = vmul.f32 0.6931472, %v218_v38  ;;  %v107_v43 = vsub.f32 1.0, %v106_v37 }
  0x27   :  { %v134_v45 = vsel %vm347_vm0, %v131_v30, %v128_v39  ;;  %v93_v46 = vmul.f32 %v212_v25, %v92_v40 }
  0x28   :  { %v143_v47 = vsel %vm351_vm2, %v140_v35, %v137_v42  ;;  %v144_v48 = vadd.f32 %v134_v45, %v124_v26  ;;  %v108_v50 = vmul.f32 %v214_v29, %v107_v43 }
  0x29   :  { %v145_v51 = vadd.f32 %v143_v47, %v125_v27  ;;  %v94_v52 = vadd.f32 %v212_v25, %v93_v46 }
  0x2a   :  { %v109_v55 = vadd.f32 %v214_v29, %v108_v50 }
  0x2b   :  { %v147_v56 = vadd.f32 %v145_v51, %v144_v48  ;;  %v98_v58 = vsel %vm97_vm8, %v212_v25, %v94_v52 }
  0x2c   :  { %v103_v59 = vsel %vm100_vm9, %v102_v49, %v98_v58  ;;  %v113_v60 = vsel %vm112_vm10, %v214_v29, %v109_v55 }
  0x2d   :  { %174 = vst [vmem:[#allocation8] sm:$0xff] %v147_v56  ;;  %v104_v61 = vmul.f32 %v103_v59, %v86_v54  ;;  %v118_v62 = vsel %vm115_vm11, %v117_v53, %v113_v60 }
  0x2e   :  { %v119_v63 = vmul.f32 %v118_v62, %v87_v57 }
  0x2f   :  { %v152_v0 = vmul.f32 %v104_v61, %v335_v6 }
  0x30   :  { %v153_v2 = vmul.f32 %v119_v63, %v337_v7  ;;  %v159_v3 = vadd.f32 %v119_v63, %v104_v61 }
  0x32   :  { %v154_v1 = vadd.f32 %v153_v2, %v152_v0  ;;  %176 = vst [vmem:[#allocation8 + $0x10] sm:$0xff] %v159_v3 }
  0x34   :  { %175 = vst [vmem:[#allocation8 + $0x8] sm:$0xff] %v154_v1 }
  0x35   :  { %190 = dma.vmem_to_hbm [thread:$0]  %s183_s1, 512, %s185_s23, [#allocation5], %s298_s17, %s298_s17, %s299_s18  }
  0x36   :  { %295 = dma.done.wait [#allocation5], 512  }
  0x37   :  { %296 = vsyncadd [#allocation5], 4294966784 }
  0x38   :  { %195 = vsyncpa [#allocation4], 1 }
  0x39   :  { %196 = vsyncpa [#allocation7], 1 }
  0x3a   :  { %197 = vsyncpa [#allocation5], 1 }

</bundles_post_ra>
